<compile_context>
chip_gen: v5e
topology: v5e:2x2
jax: 0.10.0
libtpu: 0.0.40
codegen_flags: <defaults>
</compile_context>

<pallas_src>
import functools

import jax
import jax.numpy as jnp
from jax.experimental import pallas as pl
from jax.experimental.pallas import tpu as pltpu


def _round_up(x, m):
    return ((x + m - 1) // m) * m


def _vmem_limits():
    """(vmem_limit_bytes, planner_budget_bytes) derived from the actual chip."""
    cap = 64 << 20                      # conservative fallback (v7x per-core VMEM)
    try:
        info = pltpu.get_tpu_info()
        cap = int(getattr(info, "vmem_capacity_bytes", cap))
    except Exception:
        pass
    limit = (cap // 8) * 7              # ~87.5%: headroom for compiler internal scratch
    budget = (limit // 4) * 3           # planner works under the limit
    return limit, budget


def _plan(rows, d_model, d_ff, x_itemsize, w_itemsize, budget):
    """Pick (row_tile, ff_chunk) under a VMEM budget."""

    def weights_bytes(chunk, bufs):
        big = (2 * d_model * chunk + chunk) * w_itemsize * bufs   # W1/W2/b1 chunks
        small = 3 * d_model * w_itemsize                          # b2, ln weight, ln bias (single-buffered)
        return big + small

    # d_ff chunking: keep W1/W2 resident if they fit, else stream 128-aligned chunks.
    ff_chunk = d_ff
    if weights_bytes(d_ff, 1) > budget // 2:
        for nk in range(2, max(d_ff // 128, 1) + 1):
            if d_ff % nk:
                continue
            c = d_ff // nk
            if c % 128:
                continue
            if weights_bytes(c, 2) <= budget // 2:
                ff_chunk = c
                break
        # TODO(synk): if d_ff has no small-enough 128-aligned divisor we fall back to
        # fully-resident weights and rely on vmem_limit_bytes (may not fit for huge d_ff).

    bufs = 1 if ff_chunk == d_ff else 2
    left = max(budget - weights_bytes(ff_chunk, bufs), 1 << 20)

    # per-row VMEM: double-buffered x + out tiles, f32 accumulator scratch,
    # f32 h + cast-h intermediates, f32 epilogue temporaries (y/z/diff).
    per_row = (2 * d_model * x_itemsize) * 2
    per_row += d_model * 4
    per_row += ff_chunk * (4 + w_itemsize)
    per_row += 3 * d_model * 4

    tile = min(1024, left // per_row, _round_up(rows, 8))
    # keep >= 4 row steps so megacore sharding / double-buffering have work to overlap
    tile = min(tile, _round_up(pl.cdiv(rows, 4), 8))
    tile = max(8, (tile // 8) * 8)
    return tile, ff_chunk


def _ln_epilogue(x, y, b2_ref, g_ref, beta_ref, o_ref, eps, d_model):
    y = y + b2_ref[...].astype(jnp.float32)
    z = y + x.astype(jnp.float32)                       # residual
    mean = jnp.mean(z, axis=-1, keepdims=True)
    diff = z - mean
    denom = jnp.float32(max(d_model - 1, 1))            # torch.std: unbiased (N-1); guard d_model==1
    var = jnp.sum(diff * diff, axis=-1, keepdims=True) / denom
    inv = pl.reciprocal(jnp.sqrt(var) + jnp.float32(eps), approx=True)
    g = g_ref[...].astype(jnp.float32)
    beta = beta_ref[...].astype(jnp.float32)
    o_ref[...] = (g * (diff * inv) + beta).astype(o_ref.dtype)


def _ffn_kernel(x_ref, w1_ref, b1_ref, w2_ref, b2_ref, g_ref, beta_ref,
                o_ref, *scratch, eps, d_model, num_k):
    # x_ref: (tile, d_model); w1: (d_model, ff_chunk); w2: (ff_chunk, d_model)
    x = x_ref[...]                                       # native dtype -> MXU-native matmul

    # conv1 chunk (1x1 conv == per-position linear): f32 accumulate, bias + ReLU on VPU in f32.
    # TODO(synk): nn.Dropout omitted (eval-mode forward => identity).
    h = jnp.dot(x, w1_ref[...], preferred_element_type=jnp.float32)
    h = jnp.maximum(h + b1_ref[...].astype(jnp.float32), 0.0)

    # conv2 chunk: cast back to weight dtype so bf16 inputs stay on the native bf16 MXU path.
    y_part = jnp.dot(h.astype(w2_ref.dtype), w2_ref[...],
                     preferred_element_type=jnp.float32)

    if num_k == 1:
        # Fast path: everything stays in vregs, no accumulator round-trip.
        _ln_epilogue(x, y_part, b2_ref, g_ref, beta_ref, o_ref, eps, d_model)
    else:
        acc_ref = scratch[0]
        k = pl.program_id(1)

        @pl.when(k == 0)
        def _():
            acc_ref[...] = jnp.zeros_like(acc_ref)

        acc_ref[...] += y_part

        @pl.when(k == num_k - 1)
        def _():
            _ln_epilogue(x, acc_ref[...], b2_ref, g_ref, beta_ref, o_ref, eps, d_model)


def _spec(shape, index_map, mode=None):
    if mode is None:
        return pl.BlockSpec(shape, index_map)
    return pl.BlockSpec(shape, index_map, pipeline_mode=mode)


def positionwise_feed_forward(x, w1, b1, w2, b2, ln_weight, ln_bias,
                              eps=1e-6, row_tile=None, ff_chunk=None):
    """x: (batch, seq, d_model).  Eval-mode forward of PositionwiseFeedForward.

    w1: (d_model, d_ff)  == conv1.weight[:, :, 0].T      b1: (d_ff,)
    w2: (d_ff, d_model)  == conv2.weight[:, :, 0].T      b2: (d_model,)
    """
    batch, seq, d_model = x.shape
    d_ff = w1.shape[1]
    rows = batch * seq
    x2d = x.reshape(rows, d_model)

    vmem_limit, budget = _vmem_limits()
    auto_tile, auto_chunk = _plan(rows, d_model, d_ff, x.dtype.itemsize,
                                  w1.dtype.itemsize, budget)
    if row_tile is None:
        row_tile = auto_tile
    row_tile = max(8, (row_tile // 8) * 8)
    if ff_chunk is None:
        ff_chunk = auto_chunk
    assert d_ff % ff_chunk == 0, "ff_chunk must evenly divide d_ff"
    num_k = d_ff // ff_chunk

    # No padding of rows: partial last row-block is handled by Pallas masking
    # (LayerNorm is strictly per-row, so garbage padding rows never contaminate valid rows).
    grid = (pl.cdiv(rows, row_tile), num_k)

    resident = pl.Buffered(1)                       # single-buffer constant-index operands
    w_mode = pl.Buffered(1) if num_k == 1 else None  # stream (double-buffer) when chunking d_ff

    kernel = functools.partial(_ffn_kernel, eps=eps, d_model=d_model, num_k=num_k)
    scratch = [] if num_k == 1 else [pltpu.VMEM((row_tile, d_model), jnp.float32)]

    out2d = pl.pallas_call(
        kernel,
        out_shape=jax.ShapeDtypeStruct((rows, d_model), x.dtype),
        grid_spec=pltpu.PrefetchScalarGridSpec(
            num_scalar_prefetch=0,
            grid=grid,
            in_specs=[
                _spec((row_tile, d_model), lambda i, k: (i, 0)),            # x tile
                _spec((d_model, ff_chunk), lambda i, k: (0, k), w_mode),     # W1 chunk
                _spec((1, ff_chunk), lambda i, k: (0, k), w_mode),           # b1 chunk
                _spec((ff_chunk, d_model), lambda i, k: (k, 0), w_mode),     # W2 chunk
                _spec((1, d_model), lambda i, k: (0, 0), resident),          # b2
                _spec((1, d_model), lambda i, k: (0, 0), resident),          # ln weight
                _spec((1, d_model), lambda i, k: (0, 0), resident),          # ln bias
            ],
            out_specs=pl.BlockSpec((row_tile, d_model), lambda i, k: (i, 0)),
            scratch_shapes=scratch,
        ),
        compiler_params=pltpu.CompilerParams(
            dimension_semantics=("parallel", "arbitrary"),
            vmem_limit_bytes=vmem_limit,
        ),
    )(x2d, w1, b1.reshape(1, d_ff), w2, b2.reshape(1, d_model),
      ln_weight.reshape(1, d_model), ln_bias.reshape(1, d_model))

    return out2d.reshape(batch, seq, d_model)


def positionwise_feed_forward_ref(x, w1, b1, w2, b2, ln_weight, ln_bias, eps=1e-6):
    """Pure-JAX reference matching the PyTorch module exactly (eval mode)."""
    x32 = x.astype(jnp.float32)
    h = jnp.maximum(x32 @ w1.astype(jnp.float32) + b1.astype(jnp.float32), 0.0)
    y = h @ w2.astype(jnp.float32) + b2.astype(jnp.float32)
    z = y + x32
    mean = jnp.mean(z, axis=-1, keepdims=True)
    std = jnp.std(z, axis=-1, keepdims=True, ddof=1)   # torch.std: unbiased (N-1)
    out = ln_weight.astype(jnp.float32) * (z - mean) / (std + eps) + ln_bias.astype(jnp.float32)
    return out.astype(x.dtype)


if __name__ == "__main__":
    key = jax.random.PRNGKey(0)
    ks = jax.random.split(key, 5)

    def make_inputs(batch, seq, d_model, d_ff, dtype=jnp.float32):
        x = jax.random.normal(ks[0], (batch, seq, d_model), dtype=dtype)
        w1 = jax.random.normal(ks[1], (d_model, d_ff), dtype=dtype) * (d_model ** -0.5)
        b1 = jax.random.normal(ks[2], (d_ff,), dtype=dtype) * 0.1
        w2 = jax.random.normal(ks[3], (d_ff, d_model), dtype=dtype) * (d_ff ** -0.5)
        b2 = jax.random.normal(ks[4], (d_model,), dtype=dtype) * 0.1
        g = jnp.ones((d_model,), dtype=dtype)      # nn.Parameter(torch.ones)
        beta = jnp.zeros((d_model,), dtype=dtype)  # nn.Parameter(torch.zeros)
        return x, w1, b1, w2, b2, g, beta

    # Case 1: lane/MXU-aligned feature dims, rows a multiple of the tile (resident weights).
    args = make_inputs(2, 16, 128, 256)
    out = jax.block_until_ready(positionwise_feed_forward(*args, eps=1e-6))
    ref = positionwise_feed_forward_ref(*args, eps=1e-6)
    assert out.shape == args[0].shape and out.dtype == args[0].dtype
    assert jnp.allclose(out, ref, atol=1e-2, rtol=1e-2), "mismatch vs reference (case 1)"

    # Case 2: ragged row count (partial, masked last row block) + forced d_ff streaming
    # (exercises the k-reduction accumulator path used on small-VMEM parts).
    args = make_inputs(3, 10, 128, 256)
    out = jax.block_until_ready(positionwise_feed_forward(*args, eps=1e-6, ff_chunk=128))
    ref = positionwise_feed_forward_ref(*args, eps=1e-6)
    assert out.shape == args[0].shape and out.dtype == args[0].dtype
    assert jnp.allclose(out, ref, atol=1e-2, rtol=1e-2), "mismatch vs reference (case 2)"

    print("KERNEL_OK")
</pallas_src>

<mosaic_0001>
module attributes {stable_mosaic.version = 11 : i64} {
  func.func @_ffn_kernel(%arg0: i32, %arg1: i32, %arg2: memref<8x128xf32, #tpu.memory_space<vmem>>, %arg3: memref<128x256xf32, #tpu.memory_space<vmem>>, %arg4: memref<1x256xf32, #tpu.memory_space<vmem>>, %arg5: memref<256x128xf32, #tpu.memory_space<vmem>>, %arg6: memref<1x128xf32, #tpu.memory_space<vmem>>, %arg7: memref<1x128xf32, #tpu.memory_space<vmem>>, %arg8: memref<1x128xf32, #tpu.memory_space<vmem>>, %arg9: memref<8x128xf32, #tpu.memory_space<vmem>>) attributes {dimension_semantics = [#tpu.dimension_semantics<parallel>, #tpu.dimension_semantics<arbitrary>], iteration_bounds = array<i64: 4, 1>, scalar_prefetch = 0 : i64, scratch_operands = 0 : i64, tpu.core_type = #tpu.core_type<tc>, window_params = [{transform_indices = @transform_0, window_bounds = array<i64: 8, 128>}, {pipeline_mode = #tpu.pipeline_mode<synchronous>, transform_indices = @transform_1, window_bounds = array<i64: 128, 256>}, {pipeline_mode = #tpu.pipeline_mode<synchronous>, transform_indices = @transform_2, window_bounds = array<i64: 1, 256>}, {pipeline_mode = #tpu.pipeline_mode<synchronous>, transform_indices = @transform_3, window_bounds = array<i64: 256, 128>}, {pipeline_mode = #tpu.pipeline_mode<synchronous>, transform_indices = @transform_4, window_bounds = array<i64: 1, 128>}, {pipeline_mode = #tpu.pipeline_mode<synchronous>, transform_indices = @transform_5, window_bounds = array<i64: 1, 128>}, {pipeline_mode = #tpu.pipeline_mode<synchronous>, transform_indices = @transform_6, window_bounds = array<i64: 1, 128>}, {transform_indices = @transform_7, window_bounds = array<i64: 8, 128>}]} {
    %c0 = arith.constant 0 : index
    %c0_0 = arith.constant 0 : index
    %0 = vector.load %arg2[%c0, %c0_0] : memref<8x128xf32, #tpu.memory_space<vmem>>, vector<8x128xf32>
    %c0_1 = arith.constant 0 : index
    %c0_2 = arith.constant 0 : index
    %1 = vector.load %arg3[%c0_1, %c0_2] : memref<128x256xf32, #tpu.memory_space<vmem>>, vector<128x256xf32>
    %cst = arith.constant dense<0.000000e+00> : vector<8x256xf32>
    %2 = tpu.matmul %0, %1, %cst {dimension_numbers = #tpu.dot_dimension_numbers<[1], [0], [0], [1], [0, 0, 1, 1], [], []>} : vector<8x128xf32>, vector<128x256xf32>, vector<8x256xf32> -> vector<8x256xf32>
    %c0_3 = arith.constant 0 : index
    %c0_4 = arith.constant 0 : index
    %3 = vector.load %arg4[%c0_3, %c0_4] : memref<1x256xf32, #tpu.memory_space<vmem>>, vector<1x256xf32>
    %4 = vector.broadcast %3 : vector<1x256xf32> to vector<8x256xf32>
    %5 = arith.addf %2, %4 : vector<8x256xf32>
    %cst_5 = arith.constant 0.000000e+00 : f32
    %6 = vector.broadcast %cst_5 : f32 to vector<8x256xf32>
    %7 = arith.maximumf %5, %6 : vector<8x256xf32>
    %c0_6 = arith.constant 0 : index
    %c0_7 = arith.constant 0 : index
    %8 = vector.load %arg5[%c0_6, %c0_7] : memref<256x128xf32, #tpu.memory_space<vmem>>, vector<256x128xf32>
    %cst_8 = arith.constant dense<0.000000e+00> : vector<8x128xf32>
    %9 = tpu.matmul %7, %8, %cst_8 {dimension_numbers = #tpu.dot_dimension_numbers<[1], [0], [0], [1], [0, 0, 1, 1], [], []>} : vector<8x256xf32>, vector<256x128xf32>, vector<8x128xf32> -> vector<8x128xf32>
    %c0_9 = arith.constant 0 : index
    %c0_10 = arith.constant 0 : index
    %10 = vector.load %arg6[%c0_9, %c0_10] : memref<1x128xf32, #tpu.memory_space<vmem>>, vector<1x128xf32>
    %11 = vector.broadcast %10 : vector<1x128xf32> to vector<8x128xf32>
    %12 = arith.addf %9, %11 : vector<8x128xf32>
    %13 = arith.addf %12, %0 : vector<8x128xf32>
    %cst_11 = arith.constant dense<0.000000e+00> : vector<8xf32>
    %14 = vector.multi_reduction <add>, %13, %cst_11 [1] : vector<8x128xf32> to vector<8xf32>
    %15 = vector.shape_cast %14 : vector<8xf32> to vector<8x1xf32>
    %cst_12 = arith.constant 1.280000e+02 : f32
    %16 = vector.broadcast %cst_12 : f32 to vector<8x1xf32>
    %17 = arith.divf %15, %16 : vector<8x1xf32>
    %18 = vector.broadcast %17 : vector<8x1xf32> to vector<8x128xf32>
    %19 = arith.subf %13, %18 : vector<8x128xf32>
    %20 = arith.mulf %19, %19 : vector<8x128xf32>
    %cst_13 = arith.constant dense<0.000000e+00> : vector<8xf32>
    %21 = vector.multi_reduction <add>, %20, %cst_13 [1] : vector<8x128xf32> to vector<8xf32>
    %22 = vector.shape_cast %21 : vector<8xf32> to vector<8x1xf32>
    %cst_14 = arith.constant 1.270000e+02 : f32
    %23 = vector.broadcast %cst_14 : f32 to vector<8x1xf32>
    %24 = arith.divf %22, %23 : vector<8x1xf32>
    %25 = math.sqrt %24 : vector<8x1xf32>
    %cst_15 = arith.constant 9.99999997E-7 : f32
    %26 = vector.broadcast %cst_15 : f32 to vector<8x1xf32>
    %27 = arith.addf %25, %26 : vector<8x1xf32>
    %28 = tpu.reciprocal %27 {approx = true} : vector<8x1xf32> -> vector<8x1xf32>
    %c0_16 = arith.constant 0 : index
    %c0_17 = arith.constant 0 : index
    %29 = vector.load %arg7[%c0_16, %c0_17] : memref<1x128xf32, #tpu.memory_space<vmem>>, vector<1x128xf32>
    %c0_18 = arith.constant 0 : index
    %c0_19 = arith.constant 0 : index
    %30 = vector.load %arg8[%c0_18, %c0_19] : memref<1x128xf32, #tpu.memory_space<vmem>>, vector<1x128xf32>
    %31 = vector.broadcast %28 : vector<8x1xf32> to vector<8x128xf32>
    %32 = arith.mulf %19, %31 : vector<8x128xf32>
    %33 = vector.broadcast %29 : vector<1x128xf32> to vector<8x128xf32>
    %34 = arith.mulf %33, %32 : vector<8x128xf32>
    %35 = vector.broadcast %30 : vector<1x128xf32> to vector<8x128xf32>
    %36 = arith.addf %34, %35 : vector<8x128xf32>
    %c0_20 = arith.constant 0 : index
    %c0_21 = arith.constant 0 : index
    %37 = vector.load %arg9[%c0_20, %c0_21] : memref<8x128xf32, #tpu.memory_space<vmem>>, vector<8x128xf32>
    tpu.vector_store %arg9[%c0_20, %c0_21], %36 {strides = array<i32>} : memref<8x128xf32, #tpu.memory_space<vmem>>, vector<8x128xf32>,
    return
  }
  func.func @transform_0(%arg0: i32, %arg1: i32) -> (i32, i32) {
    %c0_i32 = arith.constant 0 : i32
    %c0_i32_0 = arith.constant 0 : i32
    return %arg0, %c0_i32 : i32, i32
  }
  func.func @transform_1(%arg0: i32, %arg1: i32) -> (i32, i32) {
    %c0_i32 = arith.constant 0 : i32
    %c0_i32_0 = arith.constant 0 : i32
    return %c0_i32, %arg1 : i32, i32
  }
  func.func @transform_2(%arg0: i32, %arg1: i32) -> (i32, i32) {
    %c0_i32 = arith.constant 0 : i32
    %c0_i32_0 = arith.constant 0 : i32
    return %c0_i32, %arg1 : i32, i32
  }
  func.func @transform_3(%arg0: i32, %arg1: i32) -> (i32, i32) {
    %c0_i32 = arith.constant 0 : i32
    %c0_i32_0 = arith.constant 0 : i32
    return %arg1, %c0_i32 : i32, i32
  }
  func.func @transform_4(%arg0: i32, %arg1: i32) -> (i32, i32) {
    %c0_i32 = arith.constant 0 : i32
    %c0_i32_0 = arith.constant 0 : i32
    %c0_i32_1 = arith.constant 0 : i32
    return %c0_i32, %c0_i32_0 : i32, i32
  }
  func.func @transform_5(%arg0: i32, %arg1: i32) -> (i32, i32) {
    %c0_i32 = arith.constant 0 : i32
    %c0_i32_0 = arith.constant 0 : i32
    %c0_i32_1 = arith.constant 0 : i32
    return %c0_i32, %c0_i32_0 : i32, i32
  }
  func.func @transform_6(%arg0: i32, %arg1: i32) -> (i32, i32) {
    %c0_i32 = arith.constant 0 : i32
    %c0_i32_0 = arith.constant 0 : i32
    %c0_i32_1 = arith.constant 0 : i32
    return %c0_i32, %c0_i32_0 : i32, i32
  }
  func.func @transform_7(%arg0: i32, %arg1: i32) -> (i32, i32) {
    %c0_i32 = arith.constant 0 : i32
    %c0_i32_0 = arith.constant 0 : i32
    return %arg0, %c0_i32 : i32, i32
  }
}

</mosaic_0001>

<bundles_post_ra>
// kernel: tpu_custom_call.1
= control target key start
LH: loop header
LB: loop body
LE: loop exit
PB: predicated region body
PF: predicated region fallthrough
CT: control target
= control target key end

     0   :  { %s1288_s0 = inlined_call_operand.hbm [shape: f32[32,128], index: 0, kind: input, shape index: {}]   ;;  %s1289_s1 = inlined_call_operand.hbm [shape: f32[128,256], index: 1, kind: input, shape index: {}]   ;;  %s1290_s2 = inlined_call_operand.hbm [shape: f32[1,256], index: 2, kind: input, shape index: {}]   ;;  %s1291_s3 = inlined_call_operand.hbm [shape: f32[256,128], index: 3, kind: input, shape index: {}]   ;;  %s1292_s4 = inlined_call_operand.vmem [shape: f32[1,128], index: 4, kind: input, shape index: {}]   ;;  %s1293_s5 = inlined_call_operand.vmem [shape: f32[1,128], index: 5, kind: input, shape index: {}]   ;;  %s1294_s6 = inlined_call_operand.vmem [shape: f32[1,128], index: 6, kind: input, shape index: {}]   ;;  %s1295_s7 = inlined_call_operand.hbm [shape: f32[32,128], index: 7, kind: output, shape index: {}]  }
   0x1   :  { %1296 = sst [smem:[#allocation15_spill]] %s1289_s1 }
   0x2   :  { %1297 = sst [smem:[#allocation16_spill]] %s1290_s2 }
   0x3   :  { %12 = vsyncpa [#allocation3], 0 }
   0x4   :  { %14 = vsyncpa [#allocation3 + $0x1], 0 }
   0x5   :  { %15 = vsyncpa [#allocation6], 0 }
   0x6   :  { %16 = vsyncpa [#allocation9], 0 }
   0x7   :  { %17 = vsyncpa [#allocation4], 0 }
   0x8   :  { %19 = vsyncpa [#allocation4 + $0x1], 0  ;;  %s1107_s24 = smov 0   ;;  %s1109_s25 = smov 0  }
   0x9   :  { %s1111_s26 = smov 0   ;;  %s1113_s27 = smov 0  }
   0xa   :  { %s1115_s28 = smov 0   ;;  %s1117_s29 = smov 0  }
   0xb LB: > { %s717_s30 = sadd.s32 4294967295, %s1056_s29   ;;  %p719_p0 = scmp.ge.s32.totalorder %s1056_s29, 1  ;;  %s1056_s29 = sphi %s1117_s29, %s25_s29   ;;  %s1052_s28 = sphi %s1115_s28, %s1311_s28   ;;  %s1048_s27 = sphi %s1113_s27, %s1310_s27   ;;  %s1044_s26 = sphi %s1111_s26, %s1309_s26   ;;  %s1040_s25 = sphi %s1109_s25, %s1308_s25   ;;  %s1036_s24 = sphi %s1107_s24, %s1307_s24  }
   0xc   : > { %p1141_p1 = scmp.eq.s32.totalorder %s717_s30, 0  ;;  %p235_p2 = scmp.lt.s32.totalorder %s1056_s29, 5 }
   0xd   : > { %s1299_s1 = sld [smem:[#allocation15_spill]]  ;;  %s1058_s13 = smov [#allocation5]  }
   0xe   : > { %p1149_p3 = pnand %p719_p0, %p235_p2  ;;  %s251_s14 = sshll.u32 %s1058_s13, 4  ;;  %s252_s14 = int_to_ptr.vmem [resolvable:$true] %s251_s14 }
   0xf   : > { %s1302_s2 = sld [smem:[#allocation16_spill]]  ;;  %s1059_s19 = smov 256  }
  0x10   : > { %p752_p4 = pneg %p1149_p3  ;;  %s1060_s20 = smov 16  }
  0x11   : > { %s1061_s21 = smov [#allocation7]   ;;  %s280_s10 = sshll.u32 %s1291_s3, 4  ;;  %s281_s10 = int_to_ptr.hbm [resolvable:$true] %s280_s10 }
  0x12   : > { %p1157_p5 = pnand %p752_p4, %p1141_p1  ;;  %s268_s22 = sshll.u32 %s1061_s21, 4  ;;  %s269_s22 = int_to_ptr.vmem [resolvable:$true] %s268_s22 }
  0x13   : > { %s249_s11 = sshll.u32 %s1299_s1, 4  ;;  %s1062_s13 = smov [#allocation8]   ;;  %s250_s11 = int_to_ptr.hbm [resolvable:$true] %s249_s11 }
  0x14   : > { %755 = dma.hbm_to_vmem [thread:$0]  (!%p1157_p5), %s250_s11, 4096, %s252_s14, [#allocation6], %s1059_s19, %s1059_s19, %s1060_s20  }
  0x15   : > { %s266_s18 = sshll.u32 %s1302_s2, 4  ;;  %s282_s16 = sshll.u32 %s1062_s13, 4  ;;  %s267_s18 = int_to_ptr.hbm [resolvable:$true] %s266_s18  ;;  %s283_s16 = int_to_ptr.vmem [resolvable:$true] %s282_s16 }
  0x16   : > { %758 = dma.hbm_to_vmem [thread:$0]  (!%p1157_p5), %s267_s18, 32, %s269_s22, [#allocation6]  }
  0x17   : > { %s1063_s11 = smov 128   ;;  %s1064_s14 = smov 8  }
  0x18   : > { %761 = dma.hbm_to_vmem [thread:$0]  (!%p1157_p5), %s281_s10, 4096, %s283_s16, [#allocation9], %s1063_s11, %s1063_s11, %s1064_s14  }
  0x19   : > { %s718_s17 = sadd.s32 4294967294, %s1056_s29   ;;  %s37_s19 = sadd.s32 1, %s1052_s28 }
  0x1a   : > { %s44_s20 = sadd.s32 1, %s1044_s26  ;;  %p39_p6 = scmp.ge.s32.totalorder %s37_s19, 4 }
  0x1b   : > { %p51_p7 = scmp.ne.s32.totalorder %s1044_s26, %s1040_s25  ;;  %p52_p8 = scmp.eq.s32.totalorder %s1056_s29, 0 }
  0x1c   : > { %p57_p9 = scmp.ne.s32.totalorder %s1040_s25, %s1036_s24  ;;  %s1313_s19 = smov (%p39_p6, %s37_s19), 0 }
  0x1d   : > { %p1183_p10 = por %p52_p8, %p51_p7  ;;  %s41_s21 = ssub.s32 %s1052_s28, %s1313_s19 }
  0x1e   : > { %p1189_p11 = por %p1141_p1, %p57_p9  ;;  %p222_p12 = scmp.eq.s32.totalorder %s717_s30, 3 }
  0x1f   : > { %p42_p13 = scmp.eq.s32.totalorder %s41_s21, 0  ;;  %p228_p0 = scmp.eq.s32.totalorder %s718_s17, 3 }
  0x20   : > { %p1197_p2 = por %p222_p12, %p51_p7  ;;  %p773_p4 = scmp.lt.s32.totalorder %s1056_s29, 4 }
  0x21   : > { %s1203_s23 = scalar_select %p42_p13, %s1044_s26, %s44_s20  }
  0x22   : > { %p1205_p5 = por %p228_p0, %p57_p9  ;;  %s305_s10 = sand.u32 1, %s1044_s26  }
  0x23   : > { %s724_s13 = sshll.u32 %s305_s10, 3  ;;  %s725_s16 = sshll.u32 %s1052_s28, 3 }
  0x24   : > { %s313_s30 = scalar_lea.hbm %s1288_s0, %s725_s16  ;;  %s309_s21 = scalar_lea.vmem [#allocation2], %s724_s13 }
  0x25   : > { %s317_s17 = sshll.u32 %s309_s21, 4  ;;  %s315_s1 = sshll.u32 %s313_s30, 4  ;;  %s318_s17 = int_to_ptr.vmem [resolvable:$true] %s317_s17  ;;  %s316_s1 = int_to_ptr.hbm [resolvable:$true] %s315_s1 }
  0x26   : > { %p763_p6 = pnand %p773_p4, %p1183_p10  ;;  %s306_s20 = scalar_lea.sflag [#allocation3], %s305_s10 }
  0x27   : > { %326 = sbr.rel (%p1149_p3) target bundleno = 628 (0x274), region = 48  ;;  %s1219_s2 = sand.u32 (!%p1149_p3), 1, %s1040_s25  }
  0x28   : > { %765 = dma.hbm_to_vmem [thread:$0]  (!%p763_p6), %s316_s1, 128, %s318_s17, %s306_s20  }
  0x29   : > { %s727_s16 = sshll.u32 (!%p1149_p3), %s1219_s2, 3  ;;  %s329_s13 = scalar_lea.sflag (!%p1149_p3), [#allocation3], %s1219_s2 }
  0x2a   : > { %s1225_s11 = scalar_lea.vmem (!%p1149_p3), [#allocation2], %s727_s16 }
  0x2c   : > { %1019 = dma.done.wait (%p1189_p11), %s329_s13, 128  }
  0x2d   : > { %1021 = vsyncadd (%p1189_p11), %s329_s13, 4294967168 }
  0x2e   : > { %1023 = dma.done.wait (%p1141_p1), [#allocation6], 4128  }
  0x2f   : > { %1025 = vsyncadd (%p1141_p1), [#allocation6], 4294963168 }
  0x30   : > { %1027 = dma.done.wait (%p1141_p1), [#allocation9], 4096  }
  0x31   : > { %1029 = vsyncadd (%p1141_p1), [#allocation9], 4294963200  ;;  %v413_v0 = vld [vmem:[#allocation5 + $0xf0] sm:$0xff]  ;;  %v411_v1 = vld [vmem:[#allocation5 + $0xe0] sm:$0xff]  ;;  %s733_s12 = sshll.u32 %s1048_s27, 3  ;;  %s378_s20 = scalar_lea.vmem [#allocation10], %s727_s16 }
  0x32   : > { %v414_v2 = vld [vmem:[#allocation5 + $0xf8] sm:$0xff]  ;;  %421 = vmatpush.msra.mxu0 %v413_v0  ;;  %v412_v3 = vld [vmem:[#allocation5 + $0xe8] sm:$0xff]  ;;  %v409_v4 = vld [vmem:[#allocation5 + $0xd0] sm:$0xff]  ;;  %s599_s30 = scalar_lea.hbm %s1295_s7, %s733_s12  ;;  %s601_s13 = sshll.u32 %s378_s20, 4  ;;  %s602_s13 = int_to_ptr.vmem [resolvable:$true] %s601_s13 }
  0x33   : > { %441 = vmatpush.msra.mxu1 %v414_v2  ;;  %v410_v5 = vld [vmem:[#allocation5 + $0xd8] sm:$0xff]  ;;  %v407_v6 = vld [vmem:[#allocation5 + $0xc0] sm:$0xff]  ;;  %v408_v7 = vld [vmem:[#allocation5 + $0xc8] sm:$0xff]  ;;  %s589_s27 = scalar_lea.sflag [#allocation4], %s1219_s2  ;;  %s986_s15 = scalar_lea.hbm %s1295_s7, 32 }
  0x34   : > { %422 = vmatpush.msra.mxu0 %v411_v1  ;;  %v405_v8 = vld [vmem:[#allocation5 + $0xb0] sm:$0xff]  ;;  %v406_v9 = vld [vmem:[#allocation5 + $0xb8] sm:$0xff]  ;;  %v403_v10 = vld [vmem:[#allocation5 + $0xa0] sm:$0xff] }
  0x35   : > { %442 = vmatpush.msra.mxu1 %v412_v3  ;;  %v404_v11 = vld [vmem:[#allocation5 + $0xa8] sm:$0xff]  ;;  %v401_v12 = vld [vmem:[#allocation5 + $0x90] sm:$0xff]  ;;  %v402_v13 = vld [vmem:[#allocation5 + $0x98] sm:$0xff] }
  0x36   : > { %423 = vmatpush.msra.mxu0 %v409_v4  ;;  %v478_v14 = vld [vmem:[#allocation8 + $0x78] sm:$0xff]  ;;  %v477_v15 = vld [vmem:[#allocation8 + $0x70] sm:$0xff]  ;;  %v400_v18 = vld [vmem:[#allocation5 + $0x88] sm:$0xff] }
  0x37   : > { %443 = vmatpush.msra.mxu1 %v410_v5  ;;  %v494_v16 = vld [vmem:[#allocation8 + $0xf8] sm:$0xff]  ;;  %499 = vmatpush.msra.mxu2 %v478_v14  ;;  %v493_v19 = vld [vmem:[#allocation8 + $0xf0] sm:$0xff]  ;;  %v476_v20 = vld [vmem:[#allocation8 + $0x68] sm:$0xff] }
  0x38   : > { %424 = vmatpush.msra.mxu0 %v407_v6  ;;  %v399_v17 = vld [vmem:[#allocation5 + $0x80] sm:$0xff]  ;;  %519 = vmatpush.msra.mxu3 %v494_v16  ;;  %v492_v21 = vld [vmem:[#allocation8 + $0xe8] sm:$0xff]  ;;  %v398_v23 = vld [vmem:[#allocation5 + $0x78] sm:$0xff]  ;;  %v1065_v16 = vmov 128.0  }
  0x39   : > { %444 = vmatpush.msra.mxu1 %v408_v7  ;;  %v397_v22 = vld [vmem:[#allocation5 + $0x70] sm:$0xff]  ;;  %500 = vmatpush.msra.mxu2 %v477_v15  ;;  %v475_v24 = vld [vmem:[#allocation8 + $0x60] sm:$0xff]  ;;  %v474_v28 = vld [vmem:[#allocation8 + $0x58] sm:$0xff]  ;;  %838 = vrcp.f32 %v1065_v16 }
  0x3a   : > { %425 = vmatpush.msra.mxu0 %v405_v8  ;;  %520 = vmatpush.msra.mxu3 %v493_v19  ;;  %v491_v25 = vld [vmem:[#allocation8 + $0xe0] sm:$0xff]  ;;  %v490_v29 = vld [vmem:[#allocation8 + $0xd8] sm:$0xff]  ;;  %v393_v30 = vld [vmem:[#allocation5 + $0x50] sm:$0xff] }
  0x3b   : > { %445 = vmatpush.msra.mxu1 %v406_v9  ;;  %v395_v26 = vld [vmem:[#allocation5 + $0x60] sm:$0xff]  ;;  %v396_v27 = vld [vmem:[#allocation5 + $0x68] sm:$0xff]  ;;  %501 = vmatpush.msra.mxu2 %v476_v20  ;;  %v394_v32 = vld [vmem:[#allocation5 + $0x58] sm:$0xff] }
  0x3c   : > { %426 = vmatpush.msra.mxu0 %v403_v10  ;;  %521 = vmatpush.msra.mxu3 %v492_v21  ;;  %v391_v31 = vld [vmem:[#allocation5 + $0x40] sm:$0xff]  ;;  %v473_v33 = vld [vmem:[#allocation8 + $0x50] sm:$0xff]  ;;  %v392_v35 = vld [vmem:[#allocation5 + $0x48] sm:$0xff] }
  0x3d   : > { %446 = vmatpush.msra.mxu1 %v404_v11  ;;  %502 = vmatpush.msra.mxu2 %v475_v24  ;;  %v489_v34 = vld [vmem:[#allocation8 + $0xd0] sm:$0xff]  ;;  %v472_v36 = vld [vmem:[#allocation8 + $0x48] sm:$0xff]  ;;  %v471_v40 = vld [vmem:[#allocation8 + $0x40] sm:$0xff] }
  0x3e   : > { %427 = vmatpush.msra.mxu0 %v401_v12  ;;  %522 = vmatpush.msra.mxu3 %v491_v25  ;;  %v488_v37 = vld [vmem:[#allocation8 + $0xc8] sm:$0xff]  ;;  %v390_v39 = vld [vmem:[#allocation5 + $0x38] sm:$0xff]  ;;  %v487_v41 = vld [vmem:[#allocation8 + $0xc0] sm:$0xff] }
  0x3f   : > { %447 = vmatpush.msra.mxu1 %v402_v13  ;;  %503 = vmatpush.msra.mxu2 %v474_v28  ;;  %v389_v38 = vld [vmem:[#allocation5 + $0x30] sm:$0xff]  ;;  %v387_v42 = vld [vmem:[#allocation5 + $0x20] sm:$0xff]  ;;  %v388_v43 = vld [vmem:[#allocation5 + $0x28] sm:$0xff] }
  0x40   : > { %428 = vmatpush.msra.mxu0 %v399_v17  ;;  %523 = vmatpush.msra.mxu3 %v490_v29  ;;  %v470_v44 = vld [vmem:[#allocation8 + $0x38] sm:$0xff]  ;;  %v385_v46 = vld [vmem:[#allocation5 + $0x10] sm:$0xff]  ;;  %v384_v51 = vld [vmem:[#allocation5 + $0x8] sm:$0xff]  ;;  %v839_v17 = vpop.eup %838 }
  0x41   : > { %448 = vmatpush.msra.mxu1 %v400_v18  ;;  %504 = vmatpush.msra.mxu2 %v473_v33  ;;  %v486_v45 = vld [vmem:[#allocation8 + $0xb8] sm:$0xff]  ;;  %v469_v48 = vld [vmem:[#allocation8 + $0x30] sm:$0xff]  ;;  %v468_v53 = vld [vmem:[#allocation8 + $0x28] sm:$0xff]  ;;  %v543_v18 = vmul.f32 128.0, %v839_v17  ;;  %vm547_vm0 = vweird.f32 %v839_v17 }
  0x42   : > { %429 = vmatpush.msra.mxu0 %v397_v22  ;;  %524 = vmatpush.msra.mxu3 %v489_v34  ;;  %v386_v47 = vld [vmem:[#allocation5 + $0x18] sm:$0xff]  ;;  %v383_v50 = vld [vmem:[#allocation5] sm:$0xff]  ;;  %v484_v54 = vld [vmem:[#allocation8 + $0xa8] sm:$0xff] }
  0x43   : > { %449 = vmatpush.msra.mxu1 %v398_v23  ;;  %505 = vmatpush.msra.mxu2 %v472_v36  ;;  %v485_v49 = vld [vmem:[#allocation8 + $0xb0] sm:$0xff]  ;;  %v467_v55 = vld [vmem:[#allocation8 + $0x20] sm:$0xff]  ;;  %v466_v57 = vld [vmem:[#allocation8 + $0x18] sm:$0xff]  ;;  %v544_v19 = vsub.f32 1.0, %v543_v18 }
  0x44   : > { %430 = vmatpush.msra.mxu0 %v395_v26  ;;  %525 = vmatpush.msra.mxu3 %v488_v37  ;;  %v382_v52 = vld [vmem:[%s1225_s11] sm:$0xff]  ;;  %v483_v56 = vld [vmem:[#allocation8 + $0xa0] sm:$0xff]  ;;  %v415_v1 = vld [vmem:[#allocation7] sm:$0x3]  ;;  %s603_s11 = sshll.u32 %s599_s30, 4  ;;  %s604_s11 = int_to_ptr.hbm [resolvable:$true] %s603_s11 }
  0x45   : > { %450 = vmatpush.msra.mxu1 %v396_v27  ;;  %506 = vmatpush.msra.mxu2 %v471_v40  ;;  %v465_v58 = vld [vmem:[#allocation8 + $0x10] sm:$0xff]  ;;  %v482_v59 = vld [vmem:[#allocation8 + $0x98] sm:$0xff]  ;;  %v464_v60 = vld [vmem:[#allocation8 + $0x8] sm:$0xff]  ;;  %v417_v2 = vperm.slane %v415_v1, 0  ;;  %v418_v3 = vperm.slane %v415_v1, 1  ;;  %v545_v20 = vmul.f32 %v839_v17, %v544_v19  ;;  %v1066_v27 = vmov 127.0  }
  0x46   : > { %431 = vmatpush.msra.mxu0 %v393_v30  ;;  %526 = vmatpush.msra.mxu3 %v487_v41  ;;  %v481_v61 = vld [vmem:[#allocation8 + $0x90] sm:$0xff]  ;;  %v463_v62 = vld [vmem:[#allocation8] sm:$0xff]  ;;  %v480_v63 = vld [vmem:[#allocation8 + $0x88] sm:$0xff]  ;;  %840 = vrcp.f32 %v1066_v27  ;;  %s980_s1 = sshra.s32 %s604_s11, 4  ;;  %s981_s1 = int_to_ptr.hbm [resolvable:$true] %s980_s1 }
  0x47   : > { %451 = vmatpush.msra.mxu1 %v394_v32  ;;  %507 = vmatpush.msra.mxu2 %v470_v44  ;;  %v479_v0 = vld [vmem:[#allocation8 + $0x80] sm:$0xff]  ;;  %v835_v10 = vld [vmem:[%s1292_s4] ss:$0 sm:$0xff]  ;;  %v546_v21 = vadd.f32 %v839_v17, %v545_v20  ;;  %s982_s8 = scalar_lea.hbm %s981_s1, 8  ;;  %p987_p8 = scmp.lt.s32.totalorder %s981_s1, %s1295_s7 }
  0x48   : > { %432 = vmatpush.msra.mxu0 %v391_v31  ;;  %527 = vmatpush.msra.mxu3 %v486_v45  ;;  %p983_p1 = scmp.ne.s32.totalorder %s981_s1, %s982_s8  ;;  %p988_p9 = scmp.lt.s32.totalorder %s986_s15, %s982_s8 }
  0x49   : > { %452 = vmatpush.msra.mxu1 %v392_v35  ;;  %508 = vmatpush.msra.mxu2 %v469_v48  ;;  %v548_v22 = vsel %vm547_vm0, %v839_v17, %v546_v21 }
  0x4a   : > { %433 = vmatpush.msra.mxu0 %v389_v38  ;;  %528 = vmatpush.msra.mxu3 %v485_v49  ;;  %p984_p3 = pnand %p983_p1, %p1197_p2  ;;  %p989_p10 = por %p988_p9, %p987_p8 }
  0x4b   : > { %453 = vmatpush.msra.mxu1 %v390_v39  ;;  %509 = vmatpush.msra.mxu2 %v468_v53 }
  0x4c   : > { %434 = vmatpush.msra.mxu0 %v387_v42  ;;  %529 = vmatpush.msra.mxu3 %v484_v54  ;;  %v841_v28 = vpop.eup %840  ;;  %p985_p7 = pneg %p984_p3 }
  0x4d   : > { %454 = vmatpush.msra.mxu1 %v388_v43  ;;  %510 = vmatpush.msra.mxu2 %v467_v55  ;;  %v555_v29 = vmul.f32 127.0, %v841_v28  ;;  %vm559_vm1 = vweird.f32 %v841_v28 }
  0x4e   : > { %435 = vmatpush.msra.mxu0 %v385_v46  ;;  %530 = vmatpush.msra.mxu3 %v483_v56  ;;  %p990_p11 = pnand %p989_p10, %p985_p7 }
  0x4f   : > { %455 = vmatpush.msra.mxu1 %v386_v47  ;;  %511 = vmatpush.msra.mxu2 %v466_v57  ;;  %v556_v30 = vsub.f32 1.0, %v555_v29  ;;  %v836_v47 = vld [vmem:[%s1293_s5] ss:$0 sm:$0xff] }
  0x50   : > { %436 = vmatpush.msra.mxu0 %v383_v50  ;;  %531 = vmatpush.msra.mxu3 %v482_v59  ;;  %v837_v50 = vld [vmem:[%s1294_s6] ss:$0 sm:$0xff] }
  0x51   : > { %456 = vmatpush.msra.mxu1 %v384_v51  ;;  %437 = vmatmul.f32.vlgmr.msra.gmra.mxu0 %v382_v52  ;;  %v557_v31 = vmul.f32 %v841_v28, %v556_v30 }
  0x52   : > { %457 = vmatmul.f32.vlgmr.msra.gmra.mxu1 %v382_v52  ;;  %512 = vmatpush.msra.mxu2 %v465_v58 }
  0x53   : > { %532 = vmatpush.msra.mxu3 %v481_v61  ;;  %v558_v32 = vadd.f32 %v841_v28, %v557_v31 }
  0x54   : > { %513 = vmatpush.msra.mxu2 %v464_v60 }
  0x55   : > { %533 = vmatpush.msra.mxu3 %v480_v63  ;;  %v560_v33 = vsel %vm559_vm1, %v841_v28, %v558_v32 }
  0x56   : > { %514 = vmatpush.msra.mxu2 %v463_v62 }
  0x57   : > { %534 = vmatpush.msra.mxu3 %v479_v0 }
  0xce   : > { %v438_v4 = vpop.f32.mrf.mxu0 }
  0xcf   : > { %v458_v5 = vpop.f32.mrf.mxu1  ;;  %v439_v6 = vadd.f32 %v438_v4, %v417_v2 }
  0xd0   : > { %v459_v7 = vadd.f32 %v458_v5, %v418_v3 }
  0xd1   : > { %v461_v8 = vmax.f32 %v439_v6, 0.0 }
  0xd2   : > { %v462_v9 = vmax.f32 %v459_v7, 0.0 }
  0xd3   : > { %515 = vmatmul.f32.vlgmr.msra.gmra.mxu2 %v461_v8 }
  0xd4   : > { %535 = vmatmul.f32.vlgmr.msra.gmra.mxu3 %v462_v9 }
 0x156   : > { %v516_v11 = vpop.f32.mrf.mxu2 }
 0x157   : > { %v536_v12 = vpop.f32.mrf.mxu3  ;;  %v517_v13 = vadd.f32 %v835_v10, %v516_v11 }
 0x159   : > { %v537_v14 = vadd.f32 %v536_v12, %v517_v13 }
 0x15b   : > { %v539_v15 = vadd.f32 %v537_v14, %v382_v52 }
 0x15d   : > { %540 = vadd.xlane.f32.xlu0 %v539_v15 }
 0x1d0   : > { %v541_v23 = vpop.xlane.xlu0 %540 }
 0x1d1   : > { %v549_v24 = vmul.f32 %v548_v22, %v541_v23 }
 0x1d3   : > { %v550_v25 = vsub.f32 %v539_v15, %v549_v24 }
 0x1d5   : > { %v551_v26 = vmul.f32 %v550_v25, %v550_v25 }
 0x1d7   : > { %552 = vadd.xlane.f32.xlu0 %v551_v26 }
 0x24a   : > { %v553_v34 = vpop.xlane.xlu0 %552 }
 0x24b   : > { %v561_v35 = vmul.f32 %v560_v33, %v553_v34 }
 0x24d   : > { %842 = vrsqrt.f32 %v561_v35  ;;  %vm569_vm2 = vcmp.eq.f32.partialorder %v561_v35, inf  ;;  %v572_v43 = vand.u32 2147483648, %v561_v35  ;;  %vm571_vm3 = vcmp.eq.f32.partialorder %v561_v35, 0.0 }
 0x253   : > { %v843_v36 = vpop.eup %842 }
 0x254   : > { %v563_v37 = vmul.f32 %v843_v36, %v561_v35 }
 0x256   : > { %v564_v38 = vmul.f32 %v843_v36, %v563_v37 }
 0x258   : > { %v565_v39 = vmul.f32 0.5, %v564_v38 }
 0x25a   : > { %v566_v40 = vsub.f32 1.5, %v565_v39 }
 0x25c   : > { %v567_v41 = vmul.f32 %v843_v36, %v566_v40 }
 0x25e   : > { %v568_v42 = vmul.f32 %v567_v41, %v561_v35 }
 0x260   : > { %v570_v44 = vsel %vm569_vm2, %v561_v35, %v568_v42 }
 0x261   : > { %v573_v45 = vsel %vm571_vm3, %v572_v43, %v570_v44 }
 0x262   : > { %v574_v46 = vadd.f32 1e-06, %v573_v45 }
 0x264   : > { %844 = vrcp.f32 %v574_v46 }
 0x26a   : > { %v845_v48 = vpop.eup %844 }
 0x26b   : > { %v578_v49 = vmul.f32 %v845_v48, %v550_v25 }
 0x26d   : > { %v582_v51 = vmul.f32 %v836_v47, %v578_v49 }
 0x26f   : > { %v586_v52 = vadd.f32 %v837_v50, %v582_v51 }
 0x271   : > { %587 = vst [vmem:[%s378_s20] sm:$0xff] %v586_v52 }
 0x272   : > { %993 = shalt.err (!%p990_p11)
}
 0x273   : > { %750 = dma.vmem_to_hbm [thread:$0]  (%p1197_p2), %s602_s13, 128, %s604_s11, %s589_s27  }
 0x274 PF: > { %p777_p12 = scmp.ge.s32.totalorder %s1056_s29, 2  ;;  %s615_s2 = sand.u32 1, %s1036_s24  }
 0x275   : > { %s616_s14 = scalar_lea.sflag [#allocation4], %s615_s2 }
 0x276   : > { %p767_p13 = pnand %p777_p12, %p1205_p5 }
 0x278   : > { %p768_p0 = pneg %p767_p13 }
 0x27a   : > { %1031 = dma.done.wait (%p768_p0), %s616_s14, 128  }
 0x27b   : > { %1033 = vsyncadd (%p768_p0), %s616_s14, 4294967168  ;;  %s25_s29 = sadd.s32 1, %s1056_s29   ;;  %s1307_s24 = smov %s1040_s25 }
 0x27c   : > { %p22_p4 = scmp.ge.s32.totalorder %s25_s29, 6   ;;  %s1308_s25 = smov %s1044_s26 }
 0x27d   : > { %s1309_s26 = smov %s1203_s23  ;;  %s1310_s27 = smov %s1052_s28 }
 0x27e   : > { %s1311_s28 = smov %s1313_s19  ;;  %24 = sbr.rel (!%p22_p4) target bundleno = 11 (0xb), region = 108 }
 0x283   :  { %622 = vsyncpa [#allocation3], 1 }
 0x284   :  { %624 = vsyncpa [#allocation3 + $0x1], 1 }
 0x285   :  { %625 = vsyncpa [#allocation6], 1 }
 0x286   :  { %626 = vsyncpa [#allocation9], 1 }
 0x287   :  { %627 = vsyncpa [#allocation4], 1 }
 0x288   :  { %629 = vsyncpa [#allocation4 + $0x1], 1 }

</bundles_post_ra>
